<compile_context>
chip_gen: v5e
topology: v5e:2x2
jax: 0.10.0
libtpu: 0.0.40
codegen_flags: <defaults>
</compile_context>

<pallas_src>
import math
from functools import partial

import jax
import jax.numpy as jnp
from jax.experimental import pallas as pl
from jax.experimental.pallas import tpu as pltpu


def _round_up(x, m):
    return ((x + m - 1) // m) * m


def _block_conv_kernel(x_ref, w_ref, o_ref):
    # x_ref: (TMg, G*K)      bf16  -- streamed tile of grouped patches
    # w_ref: (G*K, G*C_out)  bf16  -- block-diagonal weight, VMEM resident
    # o_ref: (TMg, G*C_out)  f32   -- lane-dense output tile
    acc = jnp.dot(x_ref[...], w_ref[...], preferred_element_type=jnp.float32)
    o_ref[...] = jnp.tanh(acc).astype(o_ref.dtype)


def block_strided_convolution(x, weight, block_size, *, tmg_max=512):
    """x: (N, C_in, H, W) NCHW float32.
    weight: (C_out, C_in, bh, bw)  (PyTorch Conv2d layout).
    Returns (N, C_out, H // bh, W // bw) = tanh(conv2d(x, weight, stride=block)).
    """
    N, C_in, H, W = x.shape
    bh, bw = block_size
    C_out = weight.shape[0]
    assert H % bh == 0 and W % bw == 0
    Ho, Wo = H // bh, W // bw

    M = N * Ho * Wo                 # patch rows
    K = C_in * bh * bw              # flattened block size

    # Lane-dense grouping: pack G consecutive patch rows into one kernel row so
    # the output last dim is G*C_out >= 128 (full vreg lanes, unmasked stores).
    G = max(1, -(-128 // C_out))    # ceil(128 / C_out)
    GK, GC = G * K, G * C_out

    Mg = -(-M // G)                               # grouped rows needed
    TMg = min(tmg_max, _round_up(Mg, 16))         # grouped rows per tile
    Mg_pad = _round_up(Mg, TMg)                   # tail padding (grouped)
    M_pad = Mg_pad * G

    # --- patch extraction (pure layout ops; candidates for input fusion) ---
    xp = x.reshape(N, C_in, Ho, bh, Wo, bw)
    xp = xp.transpose(0, 2, 4, 1, 3, 5)           # (N, Ho, Wo, C_in, bh, bw)
    xp = xp.reshape(M, K).astype(jnp.bfloat16)    # (M, K) bf16
    xp = jnp.pad(xp, ((0, M_pad - M), (0, 0)))    # zero-pad the M tail
    xg = xp.reshape(Mg_pad, GK)                   # grouping = free reshape

    # Block-diagonal replicated weight (G*K, G*C_out), bf16, VMEM resident.
    wk = weight.reshape(C_out, K).T.astype(jnp.bfloat16)     # (K, C_out)
    wbd = jnp.kron(jnp.eye(G, dtype=wk.dtype), wk)           # (GK, GC)

    grid = (Mg_pad // TMg,)

    out = pl.pallas_call(
        _block_conv_kernel,
        out_shape=jax.ShapeDtypeStruct((Mg_pad, GC), x.dtype),
        grid_spec=pltpu.PrefetchScalarGridSpec(
            num_scalar_prefetch=0,
            grid=grid,
            in_specs=[
                pl.BlockSpec((TMg, GK), lambda i: (i, 0)),   # streamed X tiles
                pl.BlockSpec((GK, GC), lambda i: (0, 0)),    # resident weight
            ],
            out_specs=pl.BlockSpec((TMg, GC), lambda i: (i, 0)),
        ),
        compiler_params=pltpu.CompilerParams(
            dimension_semantics=("parallel",),   # shard M across TCs on v7x
            allow_input_fusion=[True, False],    # fuse patch-repack producer
        ),
    )(xg, wbd)

    # ungroup, drop padding, back to NCHW
    out = out.reshape(M_pad, C_out)[:M]
    out = out.reshape(N, Ho, Wo, C_out).transpose(0, 3, 1, 2)
    # TODO(synk): if the downstream consumer accepts NHWC, drop this transpose
    # (it is an extra HBM pass); kept here to match the PyTorch module exactly.
    return out


def xavier_uniform(key, shape):
    """Matches torch.nn.init.xavier_uniform_ for Conv2d weight (oc, ic, kh, kw)."""
    oc, ic, kh, kw = shape
    fan_in = ic * kh * kw
    fan_out = oc * kh * kw
    bound = math.sqrt(6.0 / (fan_in + fan_out))
    return jax.random.uniform(key, shape, jnp.float32, minval=-bound, maxval=bound)


if __name__ == "__main__":
    key = jax.random.PRNGKey(0)
    kx, kw = jax.random.split(key)

    # small shapes consistent with the module:
    # batch=2, input_channels=4, H=W=16, block_size=(4,4), output_channels=8
    N, C_in, H, W = 2, 4, 16, 16
    C_out = 8
    block_size = (4, 4)

    x = jax.random.normal(kx, (N, C_in, H, W), dtype=jnp.float32)
    weight = xavier_uniform(kw, (C_out, C_in, block_size[0], block_size[1]))

    fwd = jax.jit(partial(block_strided_convolution, block_size=block_size))
    out = jax.block_until_ready(fwd(x, weight))
    assert out.shape == (N, C_out, H // block_size[0], W // block_size[1])

    # Reference with the same bf16 rounding of the operands, exact f32 conv +
    # tanh (kernel keeps f32 accumulation and f32 tanh, so only summation order
    # and the hardware tanh approximation differ).
    xr = x.astype(jnp.bfloat16).astype(jnp.float32)
    wr = weight.astype(jnp.bfloat16).astype(jnp.float32)
    ref = jax.lax.conv_general_dilated(
        xr, wr,
        window_strides=block_size,
        padding="VALID",
        dimension_numbers=("NCHW", "OIHW", "NCHW"),
        precision=jax.lax.Precision.HIGHEST,
    )
    ref = jnp.tanh(ref)

    max_err = float(jnp.max(jnp.abs(out - ref)))
    assert jnp.allclose(out, ref, atol=5e-3, rtol=5e-3), max_err

    print("KERNEL_OK")
</pallas_src>

<mosaic_0001>
module attributes {stable_mosaic.version = 11 : i64} {
  func.func @_block_conv_kernel(%arg0: i32, %arg1: memref<16x1024xbf16, #tpu.memory_space<vmem>>, %arg2: memref<1024x128xbf16, #tpu.memory_space<vmem>>, %arg3: memref<16x128xf32, #tpu.memory_space<vmem>>) attributes {dimension_semantics = [#tpu.dimension_semantics<parallel>], iteration_bounds = array<i64: 1>, scalar_prefetch = 0 : i64, scratch_operands = 0 : i64, tpu.core_type = #tpu.core_type<tc>, window_params = [{transform_indices = @transform_0, window_bounds = array<i64: 16, 1024>}, {pipeline_mode = #tpu.pipeline_mode<synchronous>, transform_indices = @transform_1, window_bounds = array<i64: 1024, 128>}, {transform_indices = @transform_2, window_bounds = array<i64: 16, 128>}]} {
    %c0 = arith.constant 0 : index
    %c0_0 = arith.constant 0 : index
    %0 = vector.load %arg1[%c0, %c0_0] : memref<16x1024xbf16, #tpu.memory_space<vmem>>, vector<16x1024xbf16>
    %c0_1 = arith.constant 0 : index
    %c0_2 = arith.constant 0 : index
    %1 = vector.load %arg2[%c0_1, %c0_2] : memref<1024x128xbf16, #tpu.memory_space<vmem>>, vector<1024x128xbf16>
    %cst = arith.constant dense<0.000000e+00> : vector<16x128xf32>
    %2 = tpu.matmul %0, %1, %cst {dimension_numbers = #tpu.dot_dimension_numbers<[1], [0], [0], [1], [0, 0, 1, 1], [], []>} : vector<16x1024xbf16>, vector<1024x128xbf16>, vector<16x128xf32> -> vector<16x128xf32>
    %3 = math.tanh %2 : vector<16x128xf32>
    %c0_3 = arith.constant 0 : index
    %c0_4 = arith.constant 0 : index
    %4 = vector.load %arg3[%c0_3, %c0_4] : memref<16x128xf32, #tpu.memory_space<vmem>>, vector<16x128xf32>
    tpu.vector_store %arg3[%c0_3, %c0_4], %3 {strides = array<i32>} : memref<16x128xf32, #tpu.memory_space<vmem>>, vector<16x128xf32>,
    return
  }
  func.func @transform_0(%arg0: i32) -> (i32, i32) {
    %c0_i32 = arith.constant 0 : i32
    %c0_i32_0 = arith.constant 0 : i32
    return %arg0, %c0_i32 : i32, i32
  }
  func.func @transform_1(%arg0: i32) -> (i32, i32) {
    %c0_i32 = arith.constant 0 : i32
    %c0_i32_0 = arith.constant 0 : i32
    %c0_i32_1 = arith.constant 0 : i32
    return %c0_i32, %c0_i32_0 : i32, i32
  }
  func.func @transform_2(%arg0: i32) -> (i32, i32) {
    %c0_i32 = arith.constant 0 : i32
    %c0_i32_0 = arith.constant 0 : i32
    return %arg0, %c0_i32 : i32, i32
  }
}

</mosaic_0001>

<bundles_post_ra>
// kernel: block_strided_convolution.1
= control target key start
LH: loop header
LB: loop body
LE: loop exit
PB: predicated region body
PF: predicated region fallthrough
CT: control target
= control target key end

     0   :  { %s1316_s1 = inlined_call_operand.vmem [shape: bf16[1024,128], index: 1, kind: input, shape index: {}]   ;;  %s1317_s0 = inlined_call_operand.vmem [shape: bf16[16,1024], index: 0, kind: input, shape index: {}]   ;;  %s1318_s2 = inlined_call_operand.vmem [shape: f32[16,128], index: 2, kind: output, shape index: {}]  }
   0x1   :  { %v994_v0 = vld [vmem:[%s1316_s1 + $0x38] sm:$0xff]  ;;  %v993_v4 = vld [vmem:[%s1316_s1 + $0x30] sm:$0xff]  ;;  %v992_v8 = vld [vmem:[%s1316_s1 + $0x28] sm:$0xff] }
   0x2   :  { %v1002_v1 = vld [vmem:[%s1316_s1 + $0x78] sm:$0xff]  ;;  %571 = vmatpush.bf16.msra.mxu0 %v994_v0  ;;  %v1001_v5 = vld [vmem:[%s1316_s1 + $0x70] sm:$0xff]  ;;  %v1000_v9 = vld [vmem:[%s1316_s1 + $0x68] sm:$0xff] }
   0x3   :  { %v1010_v2 = vld [vmem:[%s1316_s1 + $0xb8] sm:$0xff]  ;;  %585 = vmatpush.bf16.msra.mxu1 %v1002_v1  ;;  %v1009_v6 = vld [vmem:[%s1316_s1 + $0xb0] sm:$0xff]  ;;  %v1008_v10 = vld [vmem:[%s1316_s1 + $0xa8] sm:$0xff] }
   0x4   :  { %v1018_v3 = vld [vmem:[%s1316_s1 + $0xf8] sm:$0xff]  ;;  %599 = vmatpush.bf16.msra.mxu2 %v1010_v2  ;;  %v1017_v7 = vld [vmem:[%s1316_s1 + $0xf0] sm:$0xff]  ;;  %v1016_v11 = vld [vmem:[%s1316_s1 + $0xe8] sm:$0xff] }
   0x5   :  { %613 = vmatpush.bf16.msra.mxu3 %v1018_v3  ;;  %v991_v12 = vld [vmem:[%s1316_s1 + $0x20] sm:$0xff]  ;;  %v990_v16 = vld [vmem:[%s1316_s1 + $0x18] sm:$0xff]  ;;  %v989_v20 = vld [vmem:[%s1316_s1 + $0x10] sm:$0xff] }
   0x6   :  { %572 = vmatpush.bf16.msra.mxu0 %v993_v4  ;;  %v999_v13 = vld [vmem:[%s1316_s1 + $0x60] sm:$0xff]  ;;  %v998_v17 = vld [vmem:[%s1316_s1 + $0x58] sm:$0xff]  ;;  %v997_v21 = vld [vmem:[%s1316_s1 + $0x50] sm:$0xff] }
   0x7   :  { %586 = vmatpush.bf16.msra.mxu1 %v1001_v5  ;;  %v1007_v14 = vld [vmem:[%s1316_s1 + $0xa0] sm:$0xff]  ;;  %v1006_v18 = vld [vmem:[%s1316_s1 + $0x98] sm:$0xff]  ;;  %v1005_v22 = vld [vmem:[%s1316_s1 + $0x90] sm:$0xff] }
   0x8   :  { %600 = vmatpush.bf16.msra.mxu2 %v1009_v6  ;;  %v1015_v15 = vld [vmem:[%s1316_s1 + $0xe0] sm:$0xff]  ;;  %v1014_v19 = vld [vmem:[%s1316_s1 + $0xd8] sm:$0xff]  ;;  %v1013_v23 = vld [vmem:[%s1316_s1 + $0xd0] sm:$0xff] }
   0x9   :  { %614 = vmatpush.bf16.msra.mxu3 %v1017_v7  ;;  %v988_v24 = vld [vmem:[%s1316_s1 + $0x8] sm:$0xff]  ;;  %v987_v28 = vld [vmem:[%s1316_s1] sm:$0xff]  ;;  %v1026_v32 = vld [vmem:[%s1316_s1 + $0x138] sm:$0xff] }
   0xa   :  { %573 = vmatpush.bf16.msra.mxu0 %v992_v8  ;;  %v996_v25 = vld [vmem:[%s1316_s1 + $0x48] sm:$0xff]  ;;  %v995_v29 = vld [vmem:[%s1316_s1 + $0x40] sm:$0xff]  ;;  %v1034_v33 = vld [vmem:[%s1316_s1 + $0x178] sm:$0xff] }
   0xb   :  { %587 = vmatpush.bf16.msra.mxu1 %v1000_v9  ;;  %v1004_v26 = vld [vmem:[%s1316_s1 + $0x88] sm:$0xff]  ;;  %v1003_v30 = vld [vmem:[%s1316_s1 + $0x80] sm:$0xff]  ;;  %v1042_v42 = vld [vmem:[%s1316_s1 + $0x1b8] sm:$0xff] }
   0xc   :  { %601 = vmatpush.bf16.msra.mxu2 %v1008_v10  ;;  %v1012_v27 = vld [vmem:[%s1316_s1 + $0xc8] sm:$0xff]  ;;  %v1011_v31 = vld [vmem:[%s1316_s1 + $0xc0] sm:$0xff]  ;;  %v1050_v43 = vld [vmem:[%s1316_s1 + $0x1f8] sm:$0xff] }
   0xd   :  { %615 = vmatpush.bf16.msra.mxu3 %v1016_v11  ;;  %v701_v34 = vld [vmem:[%s1317_s0 + $0x8] sm:$0xf]  ;;  %v980_v36 = vld [vmem:[%s1317_s0 + $0xc] sm:$0xf]  ;;  %v693_v38 = vld [vmem:[%s1317_s0] sm:$0xf] }
   0xe   :  { %574 = vmatpush.bf16.msra.mxu0 %v991_v12  ;;  %v984_v35 = vld [vmem:[%s1317_s0 + $0x24] sm:$0xf0]  ;;  %v703_v37 = vld [vmem:[%s1317_s0 + $0x28] sm:$0xf0]  ;;  %v983_v39 = vld [vmem:[%s1317_s0 + $0x1c] sm:$0xf0] }
   0xf   :  { %588 = vmatpush.bf16.msra.mxu1 %v999_v13  ;;  %v979_v40 = vld [vmem:[%s1317_s0 + $0x4] sm:$0xf]  ;;  %v702_v44 = vor.u32 %v984_v35, %v701_v34  ;;  %v706_v45 = vor.u32 %v980_v36, %v703_v37  ;;  %v694_v46 = vor.u32 %v983_v39, %v693_v38  ;;  %v1025_v48 = vld [vmem:[%s1316_s1 + $0x130] sm:$0xff]  ;;  %v1024_v52 = vld [vmem:[%s1316_s1 + $0x128] sm:$0xff] }
  0x10   :  { %602 = vmatpush.bf16.msra.mxu2 %v1007_v14  ;;  %v695_v41 = vld [vmem:[%s1317_s0 + $0x20] sm:$0xf0]  ;;  %v1033_v49 = vld [vmem:[%s1316_s1 + $0x170] sm:$0xff]  ;;  %v1032_v53 = vld [vmem:[%s1316_s1 + $0x168] sm:$0xff] }
  0x11   :  { %616 = vmatpush.bf16.msra.mxu3 %v1015_v15  ;;  %v698_v47 = vor.u32 %v979_v40, %v695_v41  ;;  %v1041_v50 = vld [vmem:[%s1316_s1 + $0x1b0] sm:$0xff]  ;;  %v1040_v54 = vld [vmem:[%s1316_s1 + $0x1a8] sm:$0xff]  ;;  %v1023_v56 = vld [vmem:[%s1316_s1 + $0x120] sm:$0xff] }
  0x12   :  { %575 = vmatpush.bf16.msra.mxu0 %v990_v16  ;;  %v1049_v51 = vld [vmem:[%s1316_s1 + $0x1f0] sm:$0xff]  ;;  %v1048_v55 = vld [vmem:[%s1316_s1 + $0x1e8] sm:$0xff]  ;;  %v1031_v57 = vld [vmem:[%s1316_s1 + $0x160] sm:$0xff] }
  0x13   :  { %589 = vmatpush.bf16.msra.mxu1 %v998_v17  ;;  %v1039_v58 = vld [vmem:[%s1316_s1 + $0x1a0] sm:$0xff]  ;;  %v1022_v60 = vld [vmem:[%s1316_s1 + $0x118] sm:$0xff]  ;;  %v1021_v0 = vld [vmem:[%s1316_s1 + $0x110] sm:$0xff] }
  0x14   :  { %603 = vmatpush.bf16.msra.mxu2 %v1006_v18  ;;  %v1047_v59 = vld [vmem:[%s1316_s1 + $0x1e0] sm:$0xff]  ;;  %v1030_v61 = vld [vmem:[%s1316_s1 + $0x158] sm:$0xff]  ;;  %v1029_v1 = vld [vmem:[%s1316_s1 + $0x150] sm:$0xff] }
  0x15   :  { %617 = vmatpush.bf16.msra.mxu3 %v1014_v19  ;;  %v1038_v62 = vld [vmem:[%s1316_s1 + $0x198] sm:$0xff]  ;;  %v1037_v2 = vld [vmem:[%s1316_s1 + $0x190] sm:$0xff]  ;;  %v1020_v4 = vld [vmem:[%s1316_s1 + $0x108] sm:$0xff] }
  0x16   :  { %576 = vmatpush.bf16.msra.mxu0 %v989_v20  ;;  %v1046_v63 = vld [vmem:[%s1316_s1 + $0x1d8] sm:$0xff]  ;;  %v1045_v3 = vld [vmem:[%s1316_s1 + $0x1d0] sm:$0xff]  ;;  %v1028_v5 = vld [vmem:[%s1316_s1 + $0x148] sm:$0xff] }
  0x17   :  { %590 = vmatpush.bf16.msra.mxu1 %v997_v21  ;;  %v1036_v6 = vld [vmem:[%s1316_s1 + $0x188] sm:$0xff]  ;;  %v1019_v8 = vld [vmem:[%s1316_s1 + $0x100] sm:$0xff]  ;;  %v709_v12 = vld [vmem:[%s1317_s0 + $0x10] sm:$0xf] }
  0x18   :  { %604 = vmatpush.bf16.msra.mxu2 %v1005_v22  ;;  %v1044_v7 = vld [vmem:[%s1316_s1 + $0x1c8] sm:$0xff]  ;;  %v1027_v9 = vld [vmem:[%s1316_s1 + $0x140] sm:$0xff]  ;;  %v985_v13 = vld [vmem:[%s1317_s0 + $0x2c] sm:$0xf0] }
  0x19   :  { %618 = vmatpush.bf16.msra.mxu3 %v1013_v23  ;;  %v1035_v10 = vld [vmem:[%s1316_s1 + $0x180] sm:$0xff]  ;;  %v981_v14 = vld [vmem:[%s1317_s0 + $0x14] sm:$0xf]  ;;  %v717_v16 = vld [vmem:[%s1317_s0 + $0x18] sm:$0xf]  ;;  %v710_v20 = vor.u32 %v985_v13, %v709_v12 }
  0x1a   :  { %577 = vmatpush.bf16.msra.mxu0 %v988_v24  ;;  %v1043_v11 = vld [vmem:[%s1316_s1 + $0x1c0] sm:$0xff]  ;;  %v711_v15 = vld [vmem:[%s1317_s0 + $0x30] sm:$0xf0]  ;;  %v986_v17 = vld [vmem:[%s1317_s0 + $0x34] sm:$0xf0] }
  0x1b   :  { %591 = vmatpush.bf16.msra.mxu1 %v996_v25  ;;  %v982_v18 = vld [vmem:[%s1317_s0 + $0x1c] sm:$0xf]  ;;  %v714_v21 = vor.u32 %v981_v14, %v711_v15  ;;  %v718_v22 = vor.u32 %v986_v17, %v717_v16 }
  0x1c   :  { %605 = vmatpush.bf16.msra.mxu2 %v1004_v26  ;;  %v719_v19 = vld [vmem:[%s1317_s0 + $0x38] sm:$0xf0] }
  0x1d   :  { %619 = vmatpush.bf16.msra.mxu3 %v1012_v27  ;;  %v722_v23 = vor.u32 %v982_v18, %v719_v19 }
  0x1e   :  { %578 = vmatpush.bf16.msra.mxu0 %v987_v28 }
  0x1f   :  { %592 = vmatpush.bf16.msra.mxu1 %v995_v29 }
  0x20   :  { %606 = vmatpush.bf16.msra.mxu2 %v1003_v30 }
  0x21   :  { %620 = vmatpush.bf16.msra.mxu3 %v1011_v31  ;;  %579 = vmatmul.bf16.vlgmr.msra.gmra.mxu0 %v694_v46 }
  0x22   :  { %627 = vmatpush.bf16.msrb.mxu0 %v1026_v32  ;;  %593 = vmatmul.bf16.vlgmr.msra.gmra.mxu1 %v698_v47 }
  0x23   :  { %641 = vmatpush.bf16.msrb.mxu1 %v1034_v33  ;;  %607 = vmatmul.bf16.vlgmr.msra.gmra.mxu2 %v702_v44 }
  0x24   :  { %655 = vmatpush.bf16.msrb.mxu2 %v1042_v42  ;;  %621 = vmatmul.bf16.vlgmr.msra.gmra.mxu3 %v706_v45 }
  0x25   :  { %669 = vmatpush.bf16.msrb.mxu3 %v1050_v43 }
  0x26   :  { %628 = vmatpush.bf16.msrb.mxu0 %v1025_v48 }
  0x27   :  { %642 = vmatpush.bf16.msrb.mxu1 %v1033_v49 }
  0x28   :  { %656 = vmatpush.bf16.msrb.mxu2 %v1041_v50 }
  0x29   :  { %670 = vmatpush.bf16.msrb.mxu3 %v1049_v51 }
  0x2a   :  { %629 = vmatpush.bf16.msrb.mxu0 %v1024_v52 }
  0x2b   :  { %643 = vmatpush.bf16.msrb.mxu1 %v1032_v53 }
  0x2c   :  { %657 = vmatpush.bf16.msrb.mxu2 %v1040_v54 }
  0x2d   :  { %671 = vmatpush.bf16.msrb.mxu3 %v1048_v55 }
  0x2e   :  { %630 = vmatpush.bf16.msrb.mxu0 %v1023_v56 }
  0x2f   :  { %644 = vmatpush.bf16.msrb.mxu1 %v1031_v57 }
  0x30   :  { %658 = vmatpush.bf16.msrb.mxu2 %v1039_v58 }
  0x31   :  { %672 = vmatpush.bf16.msrb.mxu3 %v1047_v59 }
  0x32   :  { %631 = vmatpush.bf16.msrb.mxu0 %v1022_v60 }
  0x33   :  { %645 = vmatpush.bf16.msrb.mxu1 %v1030_v61 }
  0x34   :  { %659 = vmatpush.bf16.msrb.mxu2 %v1038_v62 }
  0x35   :  { %673 = vmatpush.bf16.msrb.mxu3 %v1046_v63 }
  0x36   :  { %632 = vmatpush.bf16.msrb.mxu0 %v1021_v0 }
  0x37   :  { %646 = vmatpush.bf16.msrb.mxu1 %v1029_v1 }
  0x38   :  { %660 = vmatpush.bf16.msrb.mxu2 %v1037_v2 }
  0x39   :  { %674 = vmatpush.bf16.msrb.mxu3 %v1045_v3 }
  0x3a   :  { %633 = vmatpush.bf16.msrb.mxu0 %v1020_v4 }
  0x3b   :  { %647 = vmatpush.bf16.msrb.mxu1 %v1028_v5 }
  0x3c   :  { %661 = vmatpush.bf16.msrb.mxu2 %v1036_v6 }
  0x3d   :  { %675 = vmatpush.bf16.msrb.mxu3 %v1044_v7 }
  0x3e   :  { %634 = vmatpush.bf16.msrb.mxu0 %v1019_v8 }
  0x3f   :  { %648 = vmatpush.bf16.msrb.mxu1 %v1027_v9 }
  0x40   :  { %662 = vmatpush.bf16.msrb.mxu2 %v1035_v10 }
  0x41   :  { %676 = vmatpush.bf16.msrb.mxu3 %v1043_v11  ;;  %635 = vmatmul.bf16.vlgmr.msrb.gmra.mxu0 %v710_v20 }
  0x42   :  { %649 = vmatmul.bf16.vlgmr.msrb.gmra.mxu1 %v714_v21 }
  0x43   :  { %663 = vmatmul.bf16.vlgmr.msrb.gmra.mxu2 %v718_v22 }
  0x44   :  { %677 = vmatmul.bf16.vlgmr.msrb.gmra.mxu3 %v722_v23 }
  0x9e   :  { %v580_v24 = vpop.f32.mrf.mxu0 }
  0x9f   :  { %v594_v25 = vpop.f32.mrf.mxu1 }
  0xa0   :  { %v595_v28 = vadd.f32 %v594_v25, %v580_v24 }
  0xa6   :  { %v608_v26 = vpop.f32.mrf.mxu2  ;;  %v582_v29 = vpop.f32.mrf.mxu0 }
  0xa7   :  { %v622_v27 = vpop.f32.mrf.mxu3  ;;  %v596_v30 = vpop.f32.mrf.mxu1  ;;  %v609_v31 = vadd.f32 %v608_v26, %v595_v28 }
  0xa8   :  { %v597_v35 = vadd.f32 %v596_v30, %v582_v29 }
  0xa9   :  { %v623_v34 = vadd.f32 %v622_v27, %v609_v31 }
  0xae   :  { %v610_v32 = vpop.f32.mrf.mxu2 }
  0xaf   :  { %v624_v33 = vpop.f32.mrf.mxu3  ;;  %v611_v39 = vadd.f32 %v610_v32, %v597_v35 }
  0xb1   :  { %v625_v43 = vadd.f32 %v624_v33, %v611_v39 }
  0xbe   :  { %v636_v36 = vpop.f32.mrf.mxu0 }
  0xbf   :  { %v637_v37 = vadd.f32 %v636_v36, %v623_v34  ;;  %v650_v38 = vpop.f32.mrf.mxu1 }
  0xc1   :  { %v651_v40 = vadd.f32 %v650_v38, %v637_v37 }
  0xc6   :  { %v664_v41 = vpop.f32.mrf.mxu2  ;;  %v638_v45 = vpop.f32.mrf.mxu0 }
  0xc7   :  { %v678_v42 = vpop.f32.mrf.mxu3  ;;  %v665_v44 = vadd.f32 %v664_v41, %v651_v40  ;;  %v639_v47 = vadd.f32 %v638_v45, %v625_v43  ;;  %v652_v48 = vpop.f32.mrf.mxu1 }
  0xc9   :  { %v679_v46 = vadd.f32 %v678_v42, %v665_v44  ;;  %v653_v49 = vadd.f32 %v652_v48, %v639_v47 }
  0xcb   :  { %1051 = vtanh.f32 %v679_v46 }
  0xce   :  { %v666_v50 = vpop.f32.mrf.mxu2 }
  0xcf   :  { %v667_v51 = vadd.f32 %v666_v50, %v653_v49  ;;  %v680_v52 = vpop.f32.mrf.mxu3 }
  0xd1   :  { %v1052_v53 = vpop.eup %1051  ;;  %v681_v54 = vadd.f32 %v680_v52, %v667_v51 }
  0xd2   :  { %685 = vst [vmem:[%s1318_s2] sm:$0xff] %v1052_v53 }
  0xd3   :  { %1053 = vtanh.f32 %v681_v54 }
  0xd9   :  { %v1054_v55 = vpop.eup %1053 }
  0xda   :  { %686 = vst [vmem:[%s1318_s2 + $0x8] sm:$0xff] %v1054_v55 }

</bundles_post_ra>
